<compile_context>
chip_gen: v7x
topology: tpu7x:2x2x1
jax: 0.10.0
libtpu: 0.0.40
codegen_flags: <defaults>
</compile_context>

<pallas_src>
import jax
import jax.numpy as jnp
from jax.experimental import pallas as pl
from jax.experimental.pallas import tpu as pltpu


def _dma_copy_kernel(x_hbm_ref, o_hbm_ref, sem):
    # Single HBM->HBM DMA: the only "work" unsqueeze performs on data is none,
    # so this is a pure identity copy issued as one DMA descriptor.
    cp = pltpu.make_async_copy(x_hbm_ref, o_hbm_ref, sem)
    cp.start()
    cp.wait()


def _pallas_hbm_copy(x):
    """Identity copy of `x` via one direct HBM->HBM DMA (no VMEM staging)."""
    return pl.pallas_call(
        _dma_copy_kernel,
        out_shape=jax.ShapeDtypeStruct(x.shape, x.dtype),
        in_specs=[pl.BlockSpec(memory_space=pl.ANY)],
        out_specs=pl.BlockSpec(memory_space=pl.ANY),
        scratch_shapes=[pltpu.SemaphoreType.DMA(())],
    )(x)


def unsqueeze(x, dim):
    """JAX/Pallas equivalent of torch.Tensor.unsqueeze(dim).

    Matches PyTorch semantics: dim may be in [-(x.ndim+1), x.ndim].
    """
    ndim = x.ndim
    if not (-(ndim + 1) <= dim <= ndim):
        raise ValueError(f"dim {dim} out of range for ndim {ndim}")
    if dim < 0:
        dim = dim + ndim + 1

    out_shape = x.shape[:dim] + (1,) + x.shape[dim:]

    if x.size == 0:
        # Nothing to copy; the unsqueeze is pure metadata.
        return x.reshape(out_shape)

    # 0-d scalars: present a rank-1 view to the DMA for robustness.
    x_src = x.reshape((1,)) if x.ndim == 0 else x

    y = _pallas_hbm_copy(x_src)
    # Row-major reshape (pure metadata): element order is preserved, so
    # copy + reshape == unsqueeze exactly.
    return y.reshape(out_shape)


class Unsqueeze:
    """Mirror of the PyTorch module: stores `dim`, applies unsqueeze in forward."""

    def __init__(self, dim):
        self.dim = dim

    def __call__(self, x):
        return unsqueeze(x, self.dim)


if __name__ == "__main__":
    key = jax.random.PRNGKey(0)
    x = jax.random.normal(key, (2, 4, 16, 16), dtype=jnp.float32)

    # Module-style usage: insert new axis at position 1 -> (2, 1, 4, 16, 16)
    mod = Unsqueeze(dim=1)
    y = mod(x)
    jax.block_until_ready(y)

    ref = jnp.expand_dims(x, 1)
    assert y.shape == (2, 1, 4, 16, 16), y.shape
    assert y.dtype == x.dtype
    assert bool(jnp.array_equal(y, ref))

    # Negative-dim case, mirroring PyTorch convention.
    y_neg = unsqueeze(x, -1)
    jax.block_until_ready(y_neg)
    assert y_neg.shape == (2, 4, 16, 16, 1), y_neg.shape
    assert bool(jnp.array_equal(y_neg, jnp.expand_dims(x, -1)))

    # Ragged-size case (numel not a multiple of 128): the HBM->HBM DMA has no
    # alignment constraints, so this path is identical to the aligned one.
    x_ragged = jax.random.normal(jax.random.PRNGKey(1), (3, 5, 7), dtype=jnp.float32)
    y_ragged = unsqueeze(x_ragged, 0)
    jax.block_until_ready(y_ragged)
    assert y_ragged.shape == (1, 3, 5, 7), y_ragged.shape
    assert bool(jnp.array_equal(y_ragged, jnp.expand_dims(x_ragged, 0)))

    print("KERNEL_OK")
</pallas_src>

<mosaic_0001>
module attributes {stable_mosaic.version = 11 : i64} {
  func.func @_dma_copy_kernel(%arg0: memref<2x4x16x16xf32, #tpu.memory_space<any>>, %arg1: memref<2x4x16x16xf32, #tpu.memory_space<any>>, %arg2: memref<!tpu.dma_semaphore, #tpu.memory_space<semaphore_mem>>) attributes {dimension_semantics = [], scalar_prefetch = 0 : i64, scratch_operands = 1 : i64, tpu.core_type = #tpu.core_type<tc>} {
    tpu.enqueue_dma source(%arg0 : memref<2x4x16x16xf32, #tpu.memory_space<any>>) target(%arg1 : memref<2x4x16x16xf32, #tpu.memory_space<any>>) target_semaphore(%arg2 : memref<!tpu.dma_semaphore, #tpu.memory_space<semaphore_mem>>)
    tpu.wait_dma2 semaphore(%arg2 : memref<!tpu.dma_semaphore, #tpu.memory_space<semaphore_mem>>) src(%arg0 : memref<2x4x16x16xf32, #tpu.memory_space<any>>) dst(%arg1 : memref<2x4x16x16xf32, #tpu.memory_space<any>>)
    return
  }
}

</mosaic_0001>

<bundles_post_ra>
// kernel: tpu_custom_call.1
= control target key start
LH: loop header
LB: loop body
LE: loop exit
PB: predicated region body
PF: predicated region fallthrough
CT: control target
= control target key end

     0   :  { %s36_s6 = smov [#allocation2]   ;;  %s37_s7 = smov [#allocation3]   ;;  %s55_s0 = inlined_call_operand.hbm [shape: f32[2,4,16,16], index: 0, kind: input, shape index: {}]   ;;  %s56_s1 = inlined_call_operand.hbm [shape: f32[2,4,16,16], index: 1, kind: output, shape index: {}]  }
   0x1   :  { %s38_s8 = smov 0  }
   0x2   :  { %18 = dma.general %s55_s0, 2048, %s56_s1, %s36_s6, %s37_s7, [#allocation4], %s38_s8, 0  }
   0x3   :  { %34 = dma.done.wait [#allocation2], 2048 }
   0x4   :  { %35 = vsyncadd [#allocation2], 4294965248 }
   0x5   :  { %24 = vsyncmov [#allocation2] }
   0x8   :  { %s25_s13 = vpop.sfrf %24 }
   0x9   :  { %p30_p0 = scmp.ne.s32.totalorder %s25_s13, 0 }
   0xb   :  { %29 = shalt.err (%p30_p0)  }

</bundles_post_ra>
